<compile_context>
chip_gen: v6e
topology: v6e:2x2x1
jax: 0.10.0
libtpu: 0.0.40
codegen_flags: <defaults>
</compile_context>

<pallas_src>
import math

import jax
import jax.numpy as jnp
from jax.experimental import pallas as pl
from jax.experimental.pallas import tpu as pltpu


# ----------------------------- Pallas kernel ---------------------------------
def quad_actor_kernel(x_ref, w1_ref, b1_ref, w2_ref, b2_ref, o_ref):
    # Matmul inputs in the weight dtype (f32 by default, bf16 optional);
    # accumulation, bias add and tanh always in f32.
    x = x_ref[...].astype(w1_ref.dtype)
    h = jnp.tanh(
        jnp.dot(x, w1_ref[...], preferred_element_type=jnp.float32) + b1_ref[...]
    )
    h = h.astype(w2_ref.dtype)
    o_ref[...] = jnp.tanh(
        jnp.dot(h, w2_ref[...], preferred_element_type=jnp.float32) + b2_ref[...]
    ).astype(o_ref.dtype)


# ------------------------------ helpers ---------------------------------------
def _round_up(x, m):
    return ((x + m - 1) // m) * m


# ------------------------------ wrapper ----------------------------------------
def quad_actor_forward(params, x, *, block_b=512):
    """QuadActor.forward: tanh(tanh(x @ W1 + b1) @ W2 + b2)."""
    w1, b1, w2, b2 = params
    B, nin = x.shape
    nin_p, hidden = w1.shape

    # Feature-dim padding to the lane-dense K baked into W1 (zeros are inert).
    if nin_p != nin:
        x = jnp.pad(x, ((0, 0), (0, nin_p - nin)))

    # Batch tile selection.
    B8 = _round_up(B, 8)
    if B8 <= block_b:
        # Small batch: single grid step, minimal (<8 rows) padding.
        tb = B8
    else:
        tb = _round_up(block_b, 8)
        # v7x has 2 TensorCores: prefer an even number of "parallel" grid
        # steps so both cores stay balanced; halve the tile if that helps.
        n = -(-B // tb)
        if n > 1 and n % 2 == 1 and (tb // 2) % 8 == 0:
            tb //= 2
    Bp = _round_up(B, tb)
    if Bp != B:
        x = jnp.pad(x, ((0, Bp - B), (0, 0)))
    grid = (Bp // tb,)

    flops = 2 * Bp * (nin_p * hidden + hidden * hidden)
    transcendentals = 2 * Bp * hidden  # two tanh layers
    bytes_accessed = int(
        x.dtype.itemsize * Bp * nin_p
        + w1.size * w1.dtype.itemsize + b1.size * b1.dtype.itemsize
        + w2.size * w2.dtype.itemsize + b2.size * b2.dtype.itemsize
        + 4 * Bp * hidden
    )

    out = pl.pallas_call(
        quad_actor_kernel,
        out_shape=jax.ShapeDtypeStruct((Bp, hidden), jnp.float32),
        grid=grid,
        in_specs=[
            pl.BlockSpec((tb, nin_p), lambda i: (i, 0)),        # x tile
            pl.BlockSpec((nin_p, hidden), lambda i: (0, 0)),    # W1 (resident)
            pl.BlockSpec((1, hidden), lambda i: (0, 0)),        # b1
            pl.BlockSpec((hidden, hidden), lambda i: (0, 0)),   # W2 (resident)
            pl.BlockSpec((1, hidden), lambda i: (0, 0)),        # b2
        ],
        out_specs=pl.BlockSpec((tb, hidden), lambda i: (i, 0)),
        compiler_params=pltpu.CompilerParams(
            dimension_semantics=("parallel",),
        ),
        cost_estimate=pl.CostEstimate(
            flops=flops,
            transcendentals=transcendentals,
            bytes_accessed=bytes_accessed,
        ),
    )(x, w1, b1, w2, b2)

    return out[:B]


# --------------------------- parameter init -----------------------------------
def init_linear(key, in_features, out_features, gain, *, pad_in_to=1,
                weight_dtype=jnp.float32):
    """Orthogonal weight (gain) + zero bias, mirroring the torch init_ helper.
    Returns W as [in_padded, out] (pre-transposed, zero-padded rows) and
    b as [1, out] (always f32: bias add / tanh stay in f32)."""
    w = jax.nn.initializers.orthogonal(scale=gain)(
        key, (in_features, out_features), jnp.float32
    )
    in_p = _round_up(in_features, pad_in_to)
    if in_p != in_features:
        w = jnp.pad(w, ((0, in_p - in_features), (0, 0)))
    b = jnp.zeros((1, out_features), jnp.float32)
    return w.astype(weight_dtype), b


def make_params(key, num_inputs, hidden_size, *, weight_dtype=jnp.float32):
    gain = math.sqrt(2.0)
    k1, k2 = jax.random.split(key, 2)
    # Pad layer-1 K dim to 128 once at init (lane-dense x loads / full MXU K).
    w1, b1 = init_linear(k1, num_inputs, hidden_size, gain,
                         pad_in_to=128, weight_dtype=weight_dtype)
    w2, b2 = init_linear(k2, hidden_size, hidden_size, gain,
                         pad_in_to=1, weight_dtype=weight_dtype)
    return (w1, b1, w2, b2)


# ---------------------------- reference (pure JAX) -----------------------------
def quad_actor_ref(params, x):
    w1, b1, w2, b2 = params
    nin_p = w1.shape[0]
    if x.shape[1] != nin_p:
        x = jnp.pad(x, ((0, 0), (0, nin_p - x.shape[1])))
    h = jnp.tanh(x @ w1.astype(jnp.float32) + b1)
    return jnp.tanh(h @ w2.astype(jnp.float32) + b2)


# ------------------------------- main ------------------------------------------
if __name__ == "__main__":
    B = 160           # batch (not a multiple of 128: exercises the tb=round_up(B,8) path)
    NUM_INPUTS = 24   # observation size (padded to 128 at init)
    HIDDEN = 128      # hidden_size, lane-dense (multiple of 128)

    key = jax.random.PRNGKey(0)
    k_param, k_x = jax.random.split(key, 2)

    params = make_params(k_param, NUM_INPUTS, HIDDEN)     # f32 weights (default)
    x = jax.random.normal(k_x, (B, NUM_INPUTS), jnp.float32)

    out = quad_actor_forward(params, x)
    jax.block_until_ready(out)

    # correctness check against pure-JAX reference
    ref = quad_actor_ref(params, x)
    assert out.shape == (B, HIDDEN)
    assert jnp.allclose(out, ref, atol=1e-4, rtol=1e-4)

    print("KERNEL_OK")
</pallas_src>

<mosaic_0001>
module attributes {stable_mosaic.version = 11 : i64} {
  func.func @quad_actor_kernel(%arg0: i32, %arg1: memref<160x128xf32, #tpu.memory_space<vmem>>, %arg2: memref<128x128xf32, #tpu.memory_space<vmem>>, %arg3: memref<1x128xf32, #tpu.memory_space<vmem>>, %arg4: memref<128x128xf32, #tpu.memory_space<vmem>>, %arg5: memref<1x128xf32, #tpu.memory_space<vmem>>, %arg6: memref<160x128xf32, #tpu.memory_space<vmem>>) attributes {dimension_semantics = [#tpu.dimension_semantics<parallel>], iteration_bounds = array<i64: 1>, scalar_prefetch = 0 : i64, scratch_operands = 0 : i64, tpu.core_type = #tpu.core_type<tc>, window_params = [{transform_indices = @transform_0, window_bounds = array<i64: 160, 128>}, {pipeline_mode = #tpu.pipeline_mode<synchronous>, transform_indices = @transform_1, window_bounds = array<i64: 128, 128>}, {pipeline_mode = #tpu.pipeline_mode<synchronous>, transform_indices = @transform_2, window_bounds = array<i64: 1, 128>}, {pipeline_mode = #tpu.pipeline_mode<synchronous>, transform_indices = @transform_3, window_bounds = array<i64: 128, 128>}, {pipeline_mode = #tpu.pipeline_mode<synchronous>, transform_indices = @transform_4, window_bounds = array<i64: 1, 128>}, {transform_indices = @transform_5, window_bounds = array<i64: 160, 128>}]} {
    %c0 = arith.constant 0 : index
    %c0_0 = arith.constant 0 : index
    %0 = vector.load %arg1[%c0, %c0_0] : memref<160x128xf32, #tpu.memory_space<vmem>>, vector<160x128xf32>
    %c0_1 = arith.constant 0 : index
    %c0_2 = arith.constant 0 : index
    %1 = vector.load %arg2[%c0_1, %c0_2] : memref<128x128xf32, #tpu.memory_space<vmem>>, vector<128x128xf32>
    %cst = arith.constant dense<0.000000e+00> : vector<160x128xf32>
    %2 = tpu.matmul %0, %1, %cst {dimension_numbers = #tpu.dot_dimension_numbers<[1], [0], [0], [1], [0, 0, 1, 1], [], []>} : vector<160x128xf32>, vector<128x128xf32>, vector<160x128xf32> -> vector<160x128xf32>
    %c0_3 = arith.constant 0 : index
    %c0_4 = arith.constant 0 : index
    %3 = vector.load %arg3[%c0_3, %c0_4] : memref<1x128xf32, #tpu.memory_space<vmem>>, vector<1x128xf32>
    %4 = vector.broadcast %3 : vector<1x128xf32> to vector<160x128xf32>
    %5 = arith.addf %2, %4 : vector<160x128xf32>
    %6 = math.tanh %5 : vector<160x128xf32>
    %c0_5 = arith.constant 0 : index
    %c0_6 = arith.constant 0 : index
    %7 = vector.load %arg4[%c0_5, %c0_6] : memref<128x128xf32, #tpu.memory_space<vmem>>, vector<128x128xf32>
    %cst_7 = arith.constant dense<0.000000e+00> : vector<160x128xf32>
    %8 = tpu.matmul %6, %7, %cst_7 {dimension_numbers = #tpu.dot_dimension_numbers<[1], [0], [0], [1], [0, 0, 1, 1], [], []>} : vector<160x128xf32>, vector<128x128xf32>, vector<160x128xf32> -> vector<160x128xf32>
    %c0_8 = arith.constant 0 : index
    %c0_9 = arith.constant 0 : index
    %9 = vector.load %arg5[%c0_8, %c0_9] : memref<1x128xf32, #tpu.memory_space<vmem>>, vector<1x128xf32>
    %10 = vector.broadcast %9 : vector<1x128xf32> to vector<160x128xf32>
    %11 = arith.addf %8, %10 : vector<160x128xf32>
    %12 = math.tanh %11 : vector<160x128xf32>
    %c0_10 = arith.constant 0 : index
    %c0_11 = arith.constant 0 : index
    %13 = vector.load %arg6[%c0_10, %c0_11] : memref<160x128xf32, #tpu.memory_space<vmem>>, vector<160x128xf32>
    tpu.vector_store %arg6[%c0_10, %c0_11], %12 {strides = array<i32>} : memref<160x128xf32, #tpu.memory_space<vmem>>, vector<160x128xf32>,
    return
  }
  func.func @transform_0(%arg0: i32) -> (i32, i32) {
    %c0_i32 = arith.constant 0 : i32
    %c0_i32_0 = arith.constant 0 : i32
    return %arg0, %c0_i32 : i32, i32
  }
  func.func @transform_1(%arg0: i32) -> (i32, i32) {
    %c0_i32 = arith.constant 0 : i32
    %c0_i32_0 = arith.constant 0 : i32
    %c0_i32_1 = arith.constant 0 : i32
    return %c0_i32, %c0_i32_0 : i32, i32
  }
  func.func @transform_2(%arg0: i32) -> (i32, i32) {
    %c0_i32 = arith.constant 0 : i32
    %c0_i32_0 = arith.constant 0 : i32
    %c0_i32_1 = arith.constant 0 : i32
    return %c0_i32, %c0_i32_0 : i32, i32
  }
  func.func @transform_3(%arg0: i32) -> (i32, i32) {
    %c0_i32 = arith.constant 0 : i32
    %c0_i32_0 = arith.constant 0 : i32
    %c0_i32_1 = arith.constant 0 : i32
    return %c0_i32, %c0_i32_0 : i32, i32
  }
  func.func @transform_4(%arg0: i32) -> (i32, i32) {
    %c0_i32 = arith.constant 0 : i32
    %c0_i32_0 = arith.constant 0 : i32
    %c0_i32_1 = arith.constant 0 : i32
    return %c0_i32, %c0_i32_0 : i32, i32
  }
  func.func @transform_5(%arg0: i32) -> (i32, i32) {
    %c0_i32 = arith.constant 0 : i32
    %c0_i32_0 = arith.constant 0 : i32
    return %arg0, %c0_i32 : i32, i32
  }
}

</mosaic_0001>

<bundles_post_ra>
// kernel: tpu_custom_call.1
= control target key start
LH: loop header
LB: loop body
LE: loop exit
PB: predicated region body
PF: predicated region fallthrough
CT: control target
= control target key end

     0   :  { %10 = vsyncpa [#allocation3], 0  ;;  %s1016_s0 = inlined_call_operand.hbm [shape: f32[160,128], index: 0, kind: input, shape index: {}]   ;;  %s1017_s1 = inlined_call_operand.hbm [shape: f32[128,128], index: 1, kind: input, shape index: {}]   ;;  %s1018_s2 = inlined_call_operand.vmem [shape: f32[1,128], index: 2, kind: input, shape index: {}]   ;;  %s1019_s3 = inlined_call_operand.hbm [shape: f32[128,128], index: 3, kind: input, shape index: {}]   ;;  %s1020_s4 = inlined_call_operand.vmem [shape: f32[1,128], index: 4, kind: input, shape index: {}]   ;;  %s1021_s5 = inlined_call_operand.hbm [shape: f32[160,128], index: 5, kind: output, shape index: {}]  }
   0x1   :  { %11 = vsyncpa [#allocation6], 0 }
   0x2   :  { %12 = vsyncpa [#allocation4], 0  ;;  %s906_s18 = smov [#allocation5]   ;;  %s907_s20 = smov [#allocation2]  }
   0x3   :  { %s30_s19 = sshll.u32 %s906_s18, 4  ;;  %s18_s21 = sshll.u32 %s907_s20, 4  ;;  %s31_s19 = int_to_ptr.vmem [resolvable:$true] %s30_s19  ;;  %s19_s21 = int_to_ptr.vmem [resolvable:$true] %s18_s21 }
   0x4   :  { %s828_s22 = scalar_lea.vmem %s31_s19, 2048  ;;  %p833_p1 = scmp.lt.s32.totalorder %s31_s19, %s31_s19 }
   0x5   :  { %p829_p0 = scmp.ne.s32.totalorder %s31_s19, %s828_s22  ;;  %p834_p2 = scmp.lt.s32.totalorder %s828_s22, %s828_s22 }
   0x7   :  { %p835_p3 = por %p834_p2, %p833_p1 }
   0x9   :  { %p836_p4 = pnand %p835_p3, %p829_p0 }
   0xb   :  { %839 = shalt.err (!%p836_p4)
}
   0xc   :  { %s908_s23 = smov 128   ;;  %s909_s24 = smov 8  }
   0xd   :  { %36 = dma.hbm_to_vmem [thread:$0]  %s1017_s1, 2048, %s31_s19, [#allocation6], %s908_s23, %s908_s23, %s909_s24  }
   0xe   :  { %s848_s27 = scalar_lea.vmem %s19_s21, 2560  ;;  %p853_p6 = scmp.lt.s32.totalorder %s19_s21, %s19_s21 }
   0xf   :  { %p849_p5 = scmp.ne.s32.totalorder %s19_s21, %s848_s27  ;;  %p854_p7 = scmp.lt.s32.totalorder %s848_s27, %s848_s27 }
  0x11   :  { %p855_p8 = por %p854_p7, %p853_p6 }
  0x13   :  { %p856_p9 = pnand %p855_p8, %p849_p5 }
  0x15   :  { %859 = shalt.err (!%p856_p9)
}
  0x16   :  { %24 = dma.hbm_to_vmem [thread:$0]  %s1016_s0, 2560, %s19_s21, [#allocation3], %s908_s23, %s908_s23, %s909_s24  }
  0x17   :  { %s910_s30 = smov [#allocation7]  }
  0x18   :  { %s44_s6 = sshll.u32 %s910_s30, 4  ;;  %s45_s6 = int_to_ptr.vmem [resolvable:$true] %s44_s6 }
  0x19   :  { %s868_s7 = scalar_lea.vmem %s45_s6, 2048  ;;  %p873_p11 = scmp.lt.s32.totalorder %s45_s6, %s45_s6 }
  0x1a   :  { %p869_p10 = scmp.ne.s32.totalorder %s45_s6, %s868_s7  ;;  %p874_p12 = scmp.lt.s32.totalorder %s868_s7, %s868_s7 }
  0x1c   :  { %p875_p13 = por %p874_p12, %p873_p11 }
  0x1e   :  { %p876_p0 = pnand %p875_p13, %p869_p10 }
  0x20   :  { %879 = shalt.err (!%p876_p0)
}
  0x21   :  { %50 = dma.hbm_to_vmem [thread:$0]  %s1019_s3, 2048, %s45_s6, [#allocation6], %s908_s23, %s908_s23, %s909_s24  }
  0x22   :  { %900 = dma.done.wait [#allocation3], 2560  }
  0x23   :  { %901 = vsyncadd [#allocation3], 4294964736 }
  0x24   :  { %902 = dma.done.wait [#allocation6], 4096  }
  0x25   :  { %903 = vsyncadd [#allocation6], 4294963200  ;;  %v97_v0 = vld [vmem:[#allocation5 + $0x78] sm:$0xff]  ;;  %v96_v1 = vld [vmem:[#allocation5 + $0x70] sm:$0xff] }
  0x26   :  { %610 = vmatprep.subr.mxu0 %v97_v0  ;;  %v95_v2 = vld [vmem:[#allocation5 + $0x68] sm:$0xff]  ;;  %v94_v3 = vld [vmem:[#allocation5 + $0x60] sm:$0xff]  ;;  %v93_v5 = vld [vmem:[#allocation5 + $0x58] sm:$0xff] }
  0x27   :  { %611 = vmatpush3.msra.mxu0 %v97_v0  ;;  %v62_v4 = vld [vmem:[#allocation2] sm:$0xff]  ;;  %v92_v6 = vld [vmem:[#allocation5 + $0x50] sm:$0xff]  ;;  %v91_v7 = vld [vmem:[#allocation5 + $0x48] sm:$0xff] }
  0x28   :  { %612 = vmatprep.subr.mxu0 %v96_v1  ;;  %642 = vmatprep.mubr.f32.mxu0 %v62_v4  ;;  %v90_v8 = vld [vmem:[#allocation5 + $0x40] sm:$0xff]  ;;  %v305_v9 = vld [vmem:[#allocation7 + $0x78] sm:$0xff]  ;;  %v304_v10 = vld [vmem:[#allocation7 + $0x70] sm:$0xff] }
  0x29   :  { %613 = vmatpush3.msra.mxu0 %v96_v1  ;;  %672 = vmatprep.subr.mxu1 %v305_v9  ;;  %v89_v11 = vld [vmem:[#allocation5 + $0x38] sm:$0xff]  ;;  %v303_v12 = vld [vmem:[#allocation7 + $0x68] sm:$0xff]  ;;  %v88_v13 = vld [vmem:[#allocation5 + $0x30] sm:$0xff] }
  0x2a   :  { %614 = vmatprep.subr.mxu0 %v95_v2  ;;  %673 = vmatpush3.msra.mxu1 %v305_v9  ;;  %v302_v14 = vld [vmem:[#allocation7 + $0x60] sm:$0xff]  ;;  %v87_v15 = vld [vmem:[#allocation5 + $0x28] sm:$0xff]  ;;  %v301_v16 = vld [vmem:[#allocation7 + $0x58] sm:$0xff] }
  0x2b   :  { %615 = vmatpush3.msra.mxu0 %v95_v2  ;;  %674 = vmatprep.subr.mxu1 %v304_v10  ;;  %v86_v17 = vld [vmem:[#allocation5 + $0x20] sm:$0xff]  ;;  %v300_v18 = vld [vmem:[#allocation7 + $0x50] sm:$0xff]  ;;  %v85_v19 = vld [vmem:[#allocation5 + $0x18] sm:$0xff] }
  0x2c   :  { %616 = vmatprep.subr.mxu0 %v94_v3  ;;  %675 = vmatpush3.msra.mxu1 %v304_v10  ;;  %v84_v20 = vld [vmem:[#allocation5 + $0x10] sm:$0xff]  ;;  %v83_v21 = vld [vmem:[#allocation5 + $0x8] sm:$0xff]  ;;  %v82_v22 = vld [vmem:[#allocation5] sm:$0xff] }
  0x2d   :  { %617 = vmatpush3.msra.mxu0 %v94_v3  ;;  %676 = vmatprep.subr.mxu1 %v303_v12  ;;  %v63_v23 = vld [vmem:[#allocation2 + $0x8] sm:$0xff]  ;;  %v64_v24 = vld [vmem:[#allocation2 + $0x10] sm:$0xff]  ;;  %v65_v25 = vld [vmem:[#allocation2 + $0x18] sm:$0xff] }
  0x2e   :  { %618 = vmatprep.subr.mxu0 %v93_v5  ;;  %677 = vmatpush3.msra.mxu1 %v303_v12  ;;  %v66_v26 = vld [vmem:[#allocation2 + $0x20] sm:$0xff]  ;;  %v67_v27 = vld [vmem:[#allocation2 + $0x28] sm:$0xff]  ;;  %v68_v28 = vld [vmem:[#allocation2 + $0x30] sm:$0xff] }
  0x2f   :  { %619 = vmatpush3.msra.mxu0 %v93_v5  ;;  %678 = vmatprep.subr.mxu1 %v302_v14  ;;  %v69_v29 = vld [vmem:[#allocation2 + $0x38] sm:$0xff]  ;;  %v70_v30 = vld [vmem:[#allocation2 + $0x40] sm:$0xff]  ;;  %v71_v31 = vld [vmem:[#allocation2 + $0x48] sm:$0xff] }
  0x30   :  { %620 = vmatprep.subr.mxu0 %v92_v6  ;;  %679 = vmatpush3.msra.mxu1 %v302_v14  ;;  %v72_v32 = vld [vmem:[#allocation2 + $0x50] sm:$0xff]  ;;  %v73_v33 = vld [vmem:[#allocation2 + $0x58] sm:$0xff]  ;;  %v74_v34 = vld [vmem:[#allocation2 + $0x60] sm:$0xff] }
  0x31   :  { %621 = vmatpush3.msra.mxu0 %v92_v6  ;;  %680 = vmatprep.subr.mxu1 %v301_v16  ;;  %v75_v35 = vld [vmem:[#allocation2 + $0x68] sm:$0xff]  ;;  %v76_v36 = vld [vmem:[#allocation2 + $0x70] sm:$0xff]  ;;  %v77_v37 = vld [vmem:[#allocation2 + $0x78] sm:$0xff] }
  0x32   :  { %622 = vmatprep.subr.mxu0 %v91_v7  ;;  %681 = vmatpush3.msra.mxu1 %v301_v16  ;;  %v78_v38 = vld [vmem:[#allocation2 + $0x80] sm:$0xff]  ;;  %v79_v39 = vld [vmem:[#allocation2 + $0x88] sm:$0xff]  ;;  %v80_v40 = vld [vmem:[#allocation2 + $0x90] sm:$0xff] }
  0x33   :  { %623 = vmatpush3.msra.mxu0 %v91_v7  ;;  %682 = vmatprep.subr.mxu1 %v300_v18  ;;  %v81_v41 = vld [vmem:[#allocation2 + $0x98] sm:$0xff]  ;;  %v299_v42 = vld [vmem:[#allocation7 + $0x48] sm:$0xff]  ;;  %v298_v43 = vld [vmem:[#allocation7 + $0x40] sm:$0xff] }
  0x34   :  { %624 = vmatprep.subr.mxu0 %v90_v8  ;;  %683 = vmatpush3.msra.mxu1 %v300_v18  ;;  %v297_v44 = vld [vmem:[#allocation7 + $0x38] sm:$0xff]  ;;  %v296_v45 = vld [vmem:[#allocation7 + $0x30] sm:$0xff]  ;;  %v295_v46 = vld [vmem:[#allocation7 + $0x28] sm:$0xff] }
  0x35   :  { %625 = vmatpush3.msra.mxu0 %v90_v8  ;;  %684 = vmatprep.subr.mxu1 %v299_v42  ;;  %v294_v47 = vld [vmem:[#allocation7 + $0x20] sm:$0xff]  ;;  %v293_v48 = vld [vmem:[#allocation7 + $0x18] sm:$0xff]  ;;  %v292_v49 = vld [vmem:[#allocation7 + $0x10] sm:$0xff] }
  0x36   :  { %626 = vmatprep.subr.mxu0 %v89_v11  ;;  %685 = vmatpush3.msra.mxu1 %v299_v42  ;;  %v291_v50 = vld [vmem:[#allocation7 + $0x8] sm:$0xff]  ;;  %v290_v51 = vld [vmem:[#allocation7] sm:$0xff] }
  0x37   :  { %627 = vmatpush3.msra.mxu0 %v89_v11  ;;  %686 = vmatprep.subr.mxu1 %v298_v43  ;;  %v963_v52 = vld [vmem:[%s1018_s2] ss:$0 sm:$0xff] }
  0x38   :  { %628 = vmatprep.subr.mxu0 %v88_v13  ;;  %687 = vmatpush3.msra.mxu1 %v298_v43 }
  0x39   :  { %629 = vmatpush3.msra.mxu0 %v88_v13  ;;  %688 = vmatprep.subr.mxu1 %v297_v44 }
  0x3a   :  { %630 = vmatprep.subr.mxu0 %v87_v15  ;;  %689 = vmatpush3.msra.mxu1 %v297_v44 }
  0x3b   :  { %631 = vmatpush3.msra.mxu0 %v87_v15  ;;  %690 = vmatprep.subr.mxu1 %v296_v45 }
  0x3c   :  { %632 = vmatprep.subr.mxu0 %v86_v17  ;;  %691 = vmatpush3.msra.mxu1 %v296_v45 }
  0x3d   :  { %633 = vmatpush3.msra.mxu0 %v86_v17  ;;  %692 = vmatprep.subr.mxu1 %v295_v46 }
  0x3e   :  { %634 = vmatprep.subr.mxu0 %v85_v19  ;;  %693 = vmatpush3.msra.mxu1 %v295_v46 }
  0x3f   :  { %635 = vmatpush3.msra.mxu0 %v85_v19  ;;  %694 = vmatprep.subr.mxu1 %v294_v47 }
  0x40   :  { %636 = vmatprep.subr.mxu0 %v84_v20  ;;  %695 = vmatpush3.msra.mxu1 %v294_v47 }
  0x41   :  { %637 = vmatpush3.msra.mxu0 %v84_v20  ;;  %696 = vmatprep.subr.mxu1 %v293_v48 }
  0x42   :  { %638 = vmatprep.subr.mxu0 %v83_v21  ;;  %697 = vmatpush3.msra.mxu1 %v293_v48 }
  0x43   :  { %639 = vmatpush3.msra.mxu0 %v83_v21  ;;  %698 = vmatprep.subr.mxu1 %v292_v49 }
  0x44   :  { %640 = vmatprep.subr.mxu0 %v82_v22  ;;  %699 = vmatpush3.msra.mxu1 %v292_v49  ;;  %v988_v49 = vld [vmem:[%s1020_s4] ss:$0 sm:$0xff]  ;;  %s911_s4 = smov [#allocation8]  }
  0x45   :  { %641 = vmatpush3.msra.mxu0 %v82_v22  ;;  %700 = vmatprep.subr.mxu1 %v291_v50  ;;  %s523_s10 = sshll.u32 %s911_s4, 4  ;;  %s524_s10 = int_to_ptr.vmem [resolvable:$true] %s523_s10 }
  0x46   :  { %643 = vmatmul.mubr.f32.vlgmr.msra.gmra.mxu0 %v63_v23  ;;  %701 = vmatpush3.msra.mxu1 %v291_v50  ;;  %s880_s11 = scalar_lea.vmem %s524_s10, 2560  ;;  %p885_p2 = scmp.lt.s32.totalorder %s524_s10, %s524_s10 }
  0x47   :  { %645 = vmatprep.mubr.f32.mxu0 %v64_v24  ;;  %702 = vmatprep.subr.mxu1 %v290_v51  ;;  %p881_p1 = scmp.ne.s32.totalorder %s524_s10, %s880_s11  ;;  %p886_p3 = scmp.lt.s32.totalorder %s880_s11, %s880_s11 }
  0x48   :  { %703 = vmatpush3.msra.mxu1 %v290_v51 }
  0x49   :  { %p887_p4 = por %p886_p3, %p885_p2 }
  0x4a   :  { %646 = vmatmul.mubr.f32.gmra.mxu0 %v65_v25 }
  0x4b   :  { %648 = vmatprep.mubr.f32.mxu0 %v66_v26  ;;  %p888_p5 = pnand %p887_p4, %p881_p1 }
  0x4e   :  { %649 = vmatmul.mubr.f32.gmra.mxu0 %v67_v27 }
  0x4f   :  { %651 = vmatprep.mubr.f32.mxu0 %v68_v28 }
  0x52   :  { %652 = vmatmul.mubr.f32.gmra.mxu0 %v69_v29 }
  0x53   :  { %654 = vmatprep.mubr.f32.mxu0 %v70_v30 }
  0x56   :  { %655 = vmatmul.mubr.f32.gmra.mxu0 %v71_v31 }
  0x57   :  { %657 = vmatprep.mubr.f32.mxu0 %v72_v32 }
  0x5a   :  { %658 = vmatmul.mubr.f32.gmra.mxu0 %v73_v33 }
  0x5b   :  { %660 = vmatprep.mubr.f32.mxu0 %v74_v34 }
  0x5e   :  { %661 = vmatmul.mubr.f32.gmra.mxu0 %v75_v35 }
  0x5f   :  { %663 = vmatprep.mubr.f32.mxu0 %v76_v36 }
  0x62   :  { %664 = vmatmul.mubr.f32.gmra.mxu0 %v77_v37 }
  0x63   :  { %666 = vmatprep.mubr.f32.mxu0 %v78_v38 }
  0x66   :  { %667 = vmatmul.mubr.f32.gmra.mxu0 %v79_v39 }
  0x67   :  { %669 = vmatprep.mubr.f32.mxu0 %v80_v40 }
  0x6a   :  { %670 = vmatmul.mubr.f32.gmra.mxu0 %v81_v41 }
 0x106   :  { %v644_v53 = vpop.f32.mrf.mxu0 }
 0x107   :  { %v177_v54 = vadd.f32 %v644_v53, %v963_v52 }
 0x108   :  { %v171_v55 = vpop.f32.mrf.mxu0 }
 0x109   :  { %v172_v56 = vadd.f32 %v963_v52, %v171_v55 }
 0x10a   :  { %v647_v57 = vpop.f32.mrf.mxu0 }
 0x10b   :  { %740 = vtanh.f32 %v172_v56  ;;  %v187_v58 = vadd.f32 %v647_v57, %v963_v52 }
 0x10c   :  { %742 = vtanh.f32 %v177_v54  ;;  %v181_v59 = vpop.f32.mrf.mxu0 }
 0x10d   :  { %v182_v60 = vadd.f32 %v963_v52, %v181_v59 }
 0x10e   :  { %v650_v61 = vpop.f32.mrf.mxu0 }
 0x10f   :  { %744 = vtanh.f32 %v182_v60  ;;  %v197_v62 = vadd.f32 %v650_v61, %v963_v52 }
 0x110   :  { %746 = vtanh.f32 %v187_v58  ;;  %v191_v63 = vpop.f32.mrf.mxu0 }
 0x111   :  { %v192_v0 = vadd.f32 %v963_v52, %v191_v63 }
 0x112   :  { %v653_v1 = vpop.f32.mrf.mxu0 }
 0x113   :  { %748 = vtanh.f32 %v192_v0  ;;  %v207_v2 = vadd.f32 %v653_v1, %v963_v52 }
 0x114   :  { %750 = vtanh.f32 %v197_v62  ;;  %v201_v3 = vpop.f32.mrf.mxu0 }
 0x115   :  { %v202_v4 = vadd.f32 %v963_v52, %v201_v3 }
 0x116   :  { %v656_v5 = vpop.f32.mrf.mxu0 }
 0x117   :  { %752 = vtanh.f32 %v202_v4  ;;  %v217_v7 = vadd.f32 %v656_v5, %v963_v52 }
 0x118   :  { %v741_v6 = vpop.eup %740  ;;  %754 = vtanh.f32 %v207_v2  ;;  %v211_v8 = vpop.f32.mrf.mxu0 }
 0x119   :  { %v743_v9 = vpop.eup %742  ;;  %v212_v10 = vadd.f32 %v963_v52, %v211_v8  ;;  %704 = vmatprep.mubr.f32.mxu1 %v741_v6 }
 0x11a   :  { %v659_v11 = vpop.f32.mrf.mxu0  ;;  %705 = vmatmul.mubr.f32.vlgmr.msra.gmra.mxu1 %v743_v9 }
 0x11b   :  { %756 = vtanh.f32 %v212_v10  ;;  %v227_v13 = vadd.f32 %v659_v11, %v963_v52 }
 0x11c   :  { %v745_v12 = vpop.eup %744  ;;  %758 = vtanh.f32 %v217_v7  ;;  %v221_v14 = vpop.f32.mrf.mxu0 }
 0x11d   :  { %v747_v15 = vpop.eup %746  ;;  %v222_v16 = vadd.f32 %v963_v52, %v221_v14  ;;  %707 = vmatprep.mubr.f32.mxu1 %v745_v12 }
 0x11e   :  { %v662_v17 = vpop.f32.mrf.mxu0  ;;  %708 = vmatmul.mubr.f32.gmra.mxu1 %v747_v15 }
 0x11f   :  { %760 = vtanh.f32 %v222_v16  ;;  %v237_v19 = vadd.f32 %v662_v17, %v963_v52 }
 0x120   :  { %v749_v18 = vpop.eup %748  ;;  %762 = vtanh.f32 %v227_v13  ;;  %v231_v20 = vpop.f32.mrf.mxu0 }
 0x121   :  { %v751_v21 = vpop.eup %750  ;;  %v232_v22 = vadd.f32 %v963_v52, %v231_v20  ;;  %710 = vmatprep.mubr.f32.mxu1 %v749_v18 }
 0x122   :  { %v665_v23 = vpop.f32.mrf.mxu0  ;;  %711 = vmatmul.mubr.f32.gmra.mxu1 %v751_v21 }
 0x123   :  { %764 = vtanh.f32 %v232_v22  ;;  %v247_v25 = vadd.f32 %v665_v23, %v963_v52 }
 0x124   :  { %v753_v24 = vpop.eup %752  ;;  %766 = vtanh.f32 %v237_v19  ;;  %v241_v26 = vpop.f32.mrf.mxu0 }
 0x125   :  { %v755_v27 = vpop.eup %754  ;;  %v242_v28 = vadd.f32 %v963_v52, %v241_v26  ;;  %713 = vmatprep.mubr.f32.mxu1 %v753_v24 }
 0x126   :  { %v668_v29 = vpop.f32.mrf.mxu0  ;;  %714 = vmatmul.mubr.f32.gmra.mxu1 %v755_v27 }
 0x127   :  { %768 = vtanh.f32 %v242_v28  ;;  %v257_v31 = vadd.f32 %v668_v29, %v963_v52 }
 0x128   :  { %v757_v30 = vpop.eup %756  ;;  %770 = vtanh.f32 %v247_v25  ;;  %v251_v32 = vpop.f32.mrf.mxu0 }
 0x129   :  { %v759_v33 = vpop.eup %758  ;;  %v252_v34 = vadd.f32 %v963_v52, %v251_v32  ;;  %716 = vmatprep.mubr.f32.mxu1 %v757_v30 }
 0x12a   :  { %v671_v35 = vpop.f32.mrf.mxu0  ;;  %717 = vmatmul.mubr.f32.gmra.mxu1 %v759_v33 }
 0x12b   :  { %772 = vtanh.f32 %v252_v34  ;;  %v267_v37 = vadd.f32 %v671_v35, %v963_v52 }
 0x12c   :  { %v761_v36 = vpop.eup %760  ;;  %774 = vtanh.f32 %v257_v31  ;;  %v261_v38 = vpop.f32.mrf.mxu0 }
 0x12d   :  { %v763_v39 = vpop.eup %762  ;;  %v262_v40 = vadd.f32 %v963_v52, %v261_v38  ;;  %719 = vmatprep.mubr.f32.mxu1 %v761_v36 }
 0x12e   :  { %720 = vmatmul.mubr.f32.gmra.mxu1 %v763_v39 }
 0x12f   :  { %776 = vtanh.f32 %v262_v40 }
 0x130   :  { %v765_v41 = vpop.eup %764  ;;  %778 = vtanh.f32 %v267_v37 }
 0x131   :  { %v767_v42 = vpop.eup %766  ;;  %722 = vmatprep.mubr.f32.mxu1 %v765_v41 }
 0x132   :  { %723 = vmatmul.mubr.f32.gmra.mxu1 %v767_v42 }
 0x134   :  { %v769_v43 = vpop.eup %768 }
 0x135   :  { %v771_v44 = vpop.eup %770  ;;  %725 = vmatprep.mubr.f32.mxu1 %v769_v43 }
 0x136   :  { %726 = vmatmul.mubr.f32.gmra.mxu1 %v771_v44 }
 0x138   :  { %v773_v45 = vpop.eup %772 }
 0x139   :  { %v775_v46 = vpop.eup %774  ;;  %728 = vmatprep.mubr.f32.mxu1 %v773_v45 }
 0x13a   :  { %729 = vmatmul.mubr.f32.gmra.mxu1 %v775_v46 }
 0x13c   :  { %v777_v47 = vpop.eup %776 }
 0x13d   :  { %v779_v48 = vpop.eup %778  ;;  %731 = vmatprep.mubr.f32.mxu1 %v777_v47 }
 0x13e   :  { %732 = vmatmul.mubr.f32.gmra.mxu1 %v779_v48 }
 0x1da   :  { %v706_v50 = vpop.f32.mrf.mxu1 }
 0x1db   :  { %v385_v51 = vadd.f32 %v706_v50, %v988_v49 }
 0x1dc   :  { %v379_v52 = vpop.f32.mrf.mxu1 }
 0x1dd   :  { %780 = vtanh.f32 %v385_v51  ;;  %v380_v53 = vadd.f32 %v988_v49, %v379_v52 }
 0x1de   :  { %v709_v54 = vpop.f32.mrf.mxu1 }
 0x1df   :  { %782 = vtanh.f32 %v380_v53  ;;  %v395_v55 = vadd.f32 %v709_v54, %v988_v49 }
 0x1e0   :  { %v389_v56 = vpop.f32.mrf.mxu1 }
 0x1e1   :  { %784 = vtanh.f32 %v395_v55  ;;  %v390_v57 = vadd.f32 %v988_v49, %v389_v56 }
 0x1e2   :  { %v712_v58 = vpop.f32.mrf.mxu1 }
 0x1e3   :  { %786 = vtanh.f32 %v390_v57  ;;  %v405_v59 = vadd.f32 %v712_v58, %v988_v49 }
 0x1e4   :  { %v399_v60 = vpop.f32.mrf.mxu1 }
 0x1e5   :  { %788 = vtanh.f32 %v405_v59  ;;  %v400_v61 = vadd.f32 %v988_v49, %v399_v60 }
 0x1e6   :  { %v715_v62 = vpop.f32.mrf.mxu1 }
 0x1e7   :  { %790 = vtanh.f32 %v400_v61  ;;  %v415_v63 = vadd.f32 %v715_v62, %v988_v49 }
 0x1e8   :  { %v409_v0 = vpop.f32.mrf.mxu1 }
 0x1e9   :  { %792 = vtanh.f32 %v415_v63  ;;  %v410_v1 = vadd.f32 %v988_v49, %v409_v0 }
 0x1ea   :  { %v781_v2 = vpop.eup %780  ;;  %v718_v3 = vpop.f32.mrf.mxu1 }
 0x1eb   :  { %499 = vst [vmem:[#allocation8 + $0x8] sm:$0xff] %v781_v2  ;;  %794 = vtanh.f32 %v410_v1  ;;  %v425_v4 = vadd.f32 %v718_v3, %v988_v49 }
 0x1ec   :  { %v783_v5 = vpop.eup %782  ;;  %v419_v6 = vpop.f32.mrf.mxu1 }
 0x1ed   :  { %498 = vst [vmem:[#allocation8] sm:$0xff] %v783_v5  ;;  %796 = vtanh.f32 %v425_v4  ;;  %v420_v7 = vadd.f32 %v988_v49, %v419_v6 }
 0x1ee   :  { %v785_v8 = vpop.eup %784  ;;  %v721_v9 = vpop.f32.mrf.mxu1 }
 0x1ef   :  { %501 = vst [vmem:[#allocation8 + $0x18] sm:$0xff] %v785_v8  ;;  %798 = vtanh.f32 %v420_v7  ;;  %v435_v10 = vadd.f32 %v721_v9, %v988_v49 }
 0x1f0   :  { %v787_v11 = vpop.eup %786  ;;  %v429_v12 = vpop.f32.mrf.mxu1 }
 0x1f1   :  { %500 = vst [vmem:[#allocation8 + $0x10] sm:$0xff] %v787_v11  ;;  %800 = vtanh.f32 %v435_v10  ;;  %v430_v13 = vadd.f32 %v988_v49, %v429_v12 }
 0x1f2   :  { %v789_v14 = vpop.eup %788  ;;  %v724_v15 = vpop.f32.mrf.mxu1 }
 0x1f3   :  { %503 = vst [vmem:[#allocation8 + $0x28] sm:$0xff] %v789_v14  ;;  %802 = vtanh.f32 %v430_v13  ;;  %v445_v16 = vadd.f32 %v724_v15, %v988_v49 }
 0x1f4   :  { %v791_v17 = vpop.eup %790  ;;  %v439_v18 = vpop.f32.mrf.mxu1 }
 0x1f5   :  { %502 = vst [vmem:[#allocation8 + $0x20] sm:$0xff] %v791_v17  ;;  %804 = vtanh.f32 %v445_v16  ;;  %v440_v19 = vadd.f32 %v988_v49, %v439_v18 }
 0x1f6   :  { %v793_v20 = vpop.eup %792  ;;  %v727_v21 = vpop.f32.mrf.mxu1 }
 0x1f7   :  { %505 = vst [vmem:[#allocation8 + $0x38] sm:$0xff] %v793_v20  ;;  %806 = vtanh.f32 %v440_v19  ;;  %v455_v22 = vadd.f32 %v727_v21, %v988_v49 }
 0x1f8   :  { %v795_v23 = vpop.eup %794  ;;  %v449_v24 = vpop.f32.mrf.mxu1 }
 0x1f9   :  { %504 = vst [vmem:[#allocation8 + $0x30] sm:$0xff] %v795_v23  ;;  %808 = vtanh.f32 %v455_v22  ;;  %v450_v25 = vadd.f32 %v988_v49, %v449_v24 }
 0x1fa   :  { %v797_v26 = vpop.eup %796  ;;  %v730_v27 = vpop.f32.mrf.mxu1 }
 0x1fb   :  { %507 = vst [vmem:[#allocation8 + $0x48] sm:$0xff] %v797_v26  ;;  %810 = vtanh.f32 %v450_v25  ;;  %v465_v28 = vadd.f32 %v730_v27, %v988_v49 }
 0x1fc   :  { %v799_v29 = vpop.eup %798  ;;  %v459_v30 = vpop.f32.mrf.mxu1 }
 0x1fd   :  { %506 = vst [vmem:[#allocation8 + $0x40] sm:$0xff] %v799_v29  ;;  %812 = vtanh.f32 %v465_v28  ;;  %v460_v31 = vadd.f32 %v988_v49, %v459_v30 }
 0x1fe   :  { %v801_v32 = vpop.eup %800  ;;  %v733_v33 = vpop.f32.mrf.mxu1 }
 0x1ff   :  { %509 = vst [vmem:[#allocation8 + $0x58] sm:$0xff] %v801_v32  ;;  %814 = vtanh.f32 %v460_v31  ;;  %v475_v34 = vadd.f32 %v733_v33, %v988_v49 }
 0x200   :  { %v803_v35 = vpop.eup %802  ;;  %v469_v36 = vpop.f32.mrf.mxu1 }
 0x201   :  { %508 = vst [vmem:[#allocation8 + $0x50] sm:$0xff] %v803_v35  ;;  %816 = vtanh.f32 %v475_v34  ;;  %v470_v37 = vadd.f32 %v988_v49, %v469_v36 }
 0x202   :  { %v805_v38 = vpop.eup %804 }
 0x203   :  { %511 = vst [vmem:[#allocation8 + $0x68] sm:$0xff] %v805_v38  ;;  %818 = vtanh.f32 %v470_v37 }
 0x204   :  { %v807_v39 = vpop.eup %806 }
 0x205   :  { %510 = vst [vmem:[#allocation8 + $0x60] sm:$0xff] %v807_v39 }
 0x206   :  { %v809_v40 = vpop.eup %808 }
 0x207   :  { %513 = vst [vmem:[#allocation8 + $0x78] sm:$0xff] %v809_v40 }
 0x208   :  { %v811_v41 = vpop.eup %810 }
 0x209   :  { %512 = vst [vmem:[#allocation8 + $0x70] sm:$0xff] %v811_v41 }
 0x20a   :  { %v813_v42 = vpop.eup %812 }
 0x20b   :  { %515 = vst [vmem:[#allocation8 + $0x88] sm:$0xff] %v813_v42 }
 0x20c   :  { %v815_v43 = vpop.eup %814 }
 0x20d   :  { %514 = vst [vmem:[#allocation8 + $0x80] sm:$0xff] %v815_v43 }
 0x20e   :  { %v817_v44 = vpop.eup %816 }
 0x20f   :  { %517 = vst [vmem:[#allocation8 + $0x98] sm:$0xff] %v817_v44 }
 0x210   :  { %v819_v45 = vpop.eup %818 }
 0x211   :  { %516 = vst [vmem:[#allocation8 + $0x90] sm:$0xff] %v819_v45 }
 0x212   :  { %891 = shalt.err (!%p888_p5)
}
 0x213   :  { %529 = dma.vmem_to_hbm [thread:$0]  %s524_s10, 2560, %s1021_s5, [#allocation4], %s908_s23, %s908_s23, %s909_s24  }
 0x214   :  { %904 = dma.done.wait [#allocation4], 2560  }
 0x215   :  { %905 = vsyncadd [#allocation4], 4294964736 }
 0x216   :  { %533 = vsyncpa [#allocation3], 1 }
 0x217   :  { %534 = vsyncpa [#allocation6], 1 }
 0x218   :  { %535 = vsyncpa [#allocation4], 1 }

</bundles_post_ra>
